<compile_context>
chip_gen: v5e
topology: v5e:2x2
jax: 0.10.0
libtpu: 0.0.40
codegen_flags: <defaults>
</compile_context>

<pallas_src>
import functools
import inspect
import math

import jax
import jax.numpy as jnp
from jax.experimental import pallas as pl
from jax.experimental.pallas import tpu as pltpu


def _round_up(x: int, m: int) -> int:
    return (x + m - 1) // m * m


def _cdiv(a: int, b: int) -> int:
    return (a + b - 1) // b


# -----------------------------------------------------------------------------
# One-time feature / hardware detection (no per-call runtime probes).
# -----------------------------------------------------------------------------
def _detect_pipeline_mode() -> bool:
    try:
        params = inspect.signature(pl.BlockSpec).parameters
    except (TypeError, ValueError):
        return False
    return hasattr(pl, "Buffered") and "pipeline_mode" in params


_HAS_BUFFERED = _detect_pipeline_mode()


@functools.lru_cache(maxsize=1)
def _vmem_capacity_bytes() -> int:
    """Per-core VMEM capacity; conservative 64 MiB (v7x-like) fallback."""
    try:
        info = pltpu.get_tpu_info()
    except Exception:  # hardware query only -- never masks kernel/compile errors
        return 64 << 20
    for attr in ("vmem_capacity_bytes", "vmem_size_bytes", "vmem_bytes"):
        val = getattr(info, attr, None)
        if isinstance(val, int) and val > 0:
            return val
    return 64 << 20


def _resident_spec(block_shape, index_map):
    """BlockSpec for a grid-invariant operand: single buffer when supported."""
    if _HAS_BUFFERED:
        return pl.BlockSpec(block_shape, index_map, pipeline_mode=pl.Buffered(1))
    return pl.BlockSpec(block_shape, index_map)


# -----------------------------------------------------------------------------
# Kernels
# -----------------------------------------------------------------------------
def _highway_kernel_fused(x_ref, w_ref, b_ref, o_ref):
    """Resident-weight path: one fused MXU push per row tile.

    x_ref: [tm, Dp]   w_ref: [Dp, 2*Dp]   b_ref: [1, 2*Dp]   o_ref: [tm, Dp]
    """
    dp = o_ref.shape[-1]
    x = x_ref[...]
    acc = jnp.dot(x, w_ref[...], preferred_element_type=jnp.float32)
    acc = acc + b_ref[...].astype(jnp.float32)
    z = jnp.maximum(acc[:, :dp], 0.0)                  # relu(linear)
    t = 0.5 * (jnp.tanh(0.5 * acc[:, dp:]) + 1.0)      # sigmoid(gate), 1 EUP push
    x_f32 = x.astype(jnp.float32)
    o_ref[...] = (x_f32 + t * (z - x_f32)).astype(o_ref.dtype)


def _highway_kernel_ktiled(xk_ref, xr_ref, w_ref, b_ref, o_ref, acc_ref):
    """Streaming-weight path: contraction split over grid axis 1 ("arbitrary").

    xk_ref : [tm, tk]    K-slice of the row tile (feeds the MXU)
    xr_ref : [tm, Dp]    full row tile (residual; index constant along k)
    w_ref  : [tk, 2*Dp]  streamed fused-weight K-slice (double-buffered)
    b_ref  : [1, 2*Dp]
    o_ref  : [tm, Dp]
    acc_ref: [tm, 2*Dp]  f32 accumulator scratch
    """
    k = pl.program_id(1)
    dp = o_ref.shape[-1]

    @pl.when(k == 0)
    def _init():
        acc_ref[...] = jnp.zeros_like(acc_ref)

    acc_ref[...] += jnp.dot(xk_ref[...], w_ref[...],
                            preferred_element_type=jnp.float32)

    @pl.when(k == pl.num_programs(1) - 1)
    def _finalize():
        acc = acc_ref[...] + b_ref[...].astype(jnp.float32)
        z = jnp.maximum(acc[:, :dp], 0.0)
        t = 0.5 * (jnp.tanh(0.5 * acc[:, dp:]) + 1.0)
        x_f32 = xr_ref[...].astype(jnp.float32)
        o_ref[...] = (x_f32 + t * (z - x_f32)).astype(o_ref.dtype)


# -----------------------------------------------------------------------------
# pallas_call builders (cached once per static configuration)
# -----------------------------------------------------------------------------
@functools.lru_cache(maxsize=None)
def _build_fused_call(np_rows, dp, tm, x_dtype, w_dtype, out_dtype, vmem_limit):
    x_isz = jnp.dtype(x_dtype).itemsize
    w_isz = jnp.dtype(w_dtype).itemsize
    o_isz = jnp.dtype(out_dtype).itemsize
    cost = pl.CostEstimate(
        flops=int(4 * np_rows * dp * dp),
        transcendentals=int(np_rows * dp),
        bytes_accessed=int(np_rows * dp * (x_isz + o_isz)
                           + dp * 2 * dp * w_isz + 2 * dp * 4),
    )
    return pl.pallas_call(
        _highway_kernel_fused,
        out_shape=jax.ShapeDtypeStruct((np_rows, dp), out_dtype),
        grid_spec=pltpu.PrefetchScalarGridSpec(
            num_scalar_prefetch=0,
            grid=(np_rows // tm,),
            in_specs=[
                pl.BlockSpec((tm, dp), lambda i: (i, 0)),          # x rows
                _resident_spec((dp, 2 * dp), lambda i: (0, 0)),    # resident fused W
                _resident_spec((1, 2 * dp), lambda i: (0, 0)),     # fused bias
            ],
            out_specs=pl.BlockSpec((tm, dp), lambda i: (i, 0)),
        ),
        compiler_params=pltpu.CompilerParams(
            dimension_semantics=("parallel",),
            vmem_limit_bytes=vmem_limit,
        ),
        cost_estimate=cost,
    )


@functools.lru_cache(maxsize=None)
def _build_ktiled_call(np_rows, dp, tm, tk, x_dtype, w_dtype, out_dtype, vmem_limit):
    n_row_tiles = np_rows // tm
    nk = dp // tk
    x_isz = jnp.dtype(x_dtype).itemsize
    w_isz = jnp.dtype(w_dtype).itemsize
    o_isz = jnp.dtype(out_dtype).itemsize
    cost = pl.CostEstimate(
        flops=int(4 * np_rows * dp * dp),
        transcendentals=int(np_rows * dp),
        bytes_accessed=int(2 * np_rows * dp * x_isz              # x (matmul + residual)
                           + np_rows * dp * o_isz
                           + n_row_tiles * dp * 2 * dp * w_isz   # W re-streamed per row tile
                           + 2 * dp * 4),
    )
    return pl.pallas_call(
        _highway_kernel_ktiled,
        out_shape=jax.ShapeDtypeStruct((np_rows, dp), out_dtype),
        grid_spec=pltpu.PrefetchScalarGridSpec(
            num_scalar_prefetch=0,
            grid=(n_row_tiles, nk),
            in_specs=[
                pl.BlockSpec((tm, tk), lambda i, k: (i, k)),       # x K-slice
                pl.BlockSpec((tm, dp), lambda i, k: (i, 0)),       # x residual rows
                pl.BlockSpec((tk, 2 * dp), lambda i, k: (k, 0)),   # streamed fused W
                _resident_spec((1, 2 * dp), lambda i, k: (0, 0)),  # fused bias
            ],
            out_specs=pl.BlockSpec((tm, dp), lambda i, k: (i, 0)),
            scratch_shapes=[pltpu.VMEM((tm, 2 * dp), jnp.float32)],
        ),
        compiler_params=pltpu.CompilerParams(
            dimension_semantics=("parallel", "arbitrary"),
            vmem_limit_bytes=vmem_limit,
        ),
        cost_estimate=cost,
    )


# -----------------------------------------------------------------------------
# Host-side API
# -----------------------------------------------------------------------------
def prepare_highway_params(w_lin, b_lin, w_gate, b_gate, *, dtype=None):
    """Fuse + 128-pad the Highway parameters ONCE (hoisted off the call path).

    w_* are stored input-major, i.e. [D_in, D_out] = PyTorch weight transposed.
    Returns (w_fused [Dp, 2*Dp], b_fused [1, 2*Dp], d).
    """
    d = int(w_lin.shape[0])
    assert w_lin.shape == (d, d) and w_gate.shape == (d, d), \
        "Highway residual requires in_features == out_features"
    dtype = jnp.dtype(dtype) if dtype is not None else jnp.dtype(w_lin.dtype)
    dp = _round_up(d, 128)
    wl = jnp.zeros((dp, dp), dtype).at[:d, :d].set(w_lin.astype(dtype))
    wg = jnp.zeros((dp, dp), dtype).at[:d, :d].set(w_gate.astype(dtype))
    w_fused = jnp.concatenate([wl, wg], axis=1)                       # [Dp, 2*Dp]
    bl = jnp.zeros((dp,), jnp.float32).at[:d].set(b_lin.astype(jnp.float32))
    bg = jnp.zeros((dp,), jnp.float32).at[:d].set(b_gate.astype(jnp.float32))
    b_fused = jnp.concatenate([bl, bg]).reshape(1, 2 * dp)            # [1, 2*Dp]
    return w_fused, b_fused, d


def highway(x, w_fused, b_fused, d, *, _force_num_k_tiles=None):
    """Highway forward.  x: [..., d];  (w_fused, b_fused, d) from prepare_highway_params."""
    orig_shape = x.shape
    assert orig_shape[-1] == d, f"last dim {orig_shape[-1]} != in_features {d}"
    dp = int(w_fused.shape[0])
    assert w_fused.shape == (dp, 2 * dp) and b_fused.shape == (1, 2 * dp)

    n = int(math.prod(orig_shape[:-1]))
    x2 = x.reshape(n, d)

    # Run the MXU in the activation dtype (explicit -- no silent promotion).
    if w_fused.dtype != x2.dtype:
        w_fused = w_fused.astype(x2.dtype)
    # TODO(synk): for v5e-heavy deployments, prepare the params (and cast x) in
    # bfloat16 once to hit the MXU's bf16 rate; accumulation stays f32 in-kernel.

    x_isz = x2.dtype.itemsize
    w_isz = w_fused.dtype.itemsize

    # ---- generation-aware VMEM budget & default row tile ---------------------
    vmem_cap = _vmem_capacity_bytes()
    big_vmem = vmem_cap >= (96 << 20)                    # v5e / v6e: 128 MiB VMEM
    budget = (100 << 20) if big_vmem else (52 << 20)     # v7x: 64 MiB VMEM
    tm_target = 512 if big_vmem else 256

    # ---- row tiling: 8-aligned, exact divisibility, minimal padding ----------
    np8 = _round_up(max(n, 1), 8)
    num_row_tiles = _cdiv(np8, tm_target)
    # 64-MiB parts (v7x) have 2 TensorCores: give tiny batches >=2 grid steps
    # so the "parallel" row axis can be sharded across both cores.
    if not big_vmem and num_row_tiles == 1 and np8 >= 16:
        num_row_tiles = 2
    tm = _round_up(_cdiv(np8, num_row_tiles), 8)
    np_rows = num_row_tiles * tm

    # ---- VMEM models for the two paths ----------------------------------------
    def fused_vmem(tm_):
        w_bufs = 1 if _HAS_BUFFERED else 2
        return (w_bufs * dp * 2 * dp * w_isz             # resident fused W
                + 2 * 2 * dp * 4                         # fused bias
                + 2 * tm_ * dp * x_isz                   # x rows (double-buffered)
                + 2 * tm_ * dp * x_isz                   # out rows (double-buffered)
                + 2 * tm_ * 2 * dp * 4)                  # f32 intermediates headroom

    def ktiled_vmem(tm_, tk_):
        return (2 * tk_ * 2 * dp * w_isz                 # streamed W (double-buffered)
                + 2 * 2 * dp * 4                         # fused bias
                + 2 * tm_ * tk_ * x_isz                  # x K-slices (double-buffered)
                + 2 * tm_ * dp * x_isz                   # x residual rows
                + 2 * tm_ * dp * x_isz                   # out rows
                + tm_ * 2 * dp * 4                       # f32 accumulator scratch
                + tm_ * 2 * dp * 4)                      # finalize intermediates

    def pick_tk(tm_):
        units = dp // 128
        for nk_ in range(2, units + 1):                  # smallest nk => largest tk
            if units % nk_:
                continue
            if ktiled_vmem(tm_, dp // nk_) <= budget:
                return dp // nk_
        return 128

    if _force_num_k_tiles is not None:
        assert dp % (128 * _force_num_k_tiles) == 0
        use_ktiled, tk = True, dp // int(_force_num_k_tiles)
    elif fused_vmem(tm) <= budget:
        use_ktiled, tk = False, dp                       # resident-weight fast path
    else:
        use_ktiled = True
        # Prefer K-tiling over shrinking the MXU M tile; only reduce tm toward
        # 256 (never below) if even tk=128 does not fit the budget.
        while ktiled_vmem(tm, 128) > budget and tm > 256:
            num_row_tiles += 1
            tm = _round_up(_cdiv(np8, num_row_tiles), 8)
            np_rows = num_row_tiles * tm
        tk = pick_tk(tm)

    need = ktiled_vmem(tm, tk) if use_ktiled else fused_vmem(tm)
    vmem_limit = int(min(vmem_cap - (4 << 20), max(need + (8 << 20), 32 << 20)))

    # ---- pad activations only when actually needed -----------------------------
    pad_needed = (np_rows != n) or (dp != d)
    xp = x2
    if pad_needed:
        xp = jnp.zeros((np_rows, dp), x2.dtype).at[:n, :d].set(x2)

    if use_ktiled:
        call = _build_ktiled_call(np_rows, dp, tm, tk, x2.dtype, w_fused.dtype,
                                  x2.dtype, vmem_limit)
        out = call(xp, xp, w_fused, b_fused)
    else:
        call = _build_fused_call(np_rows, dp, tm, x2.dtype, w_fused.dtype,
                                 x2.dtype, vmem_limit)
        out = call(xp, w_fused, b_fused)

    if pad_needed:
        out = out[:n, :d]
    return out.reshape(orig_shape)


def highway_ref(x, w_lin, b_lin, w_gate, b_gate):
    z = jax.nn.relu(x @ w_lin + b_lin)
    t = jax.nn.sigmoid(x @ w_gate + b_gate)
    return t * z + (1.0 - t) * x


if __name__ == "__main__":
    # in_features == out_features (required by the residual connection).
    batch, seq, hidden = 2, 8, 32

    key = jax.random.PRNGKey(0)
    kx, k1, k2, k3, k4 = jax.random.split(key, 5)
    x = jax.random.normal(kx, (batch, seq, hidden), dtype=jnp.float32)

    # Deterministic init mimicking nn.Linear default U(-1/sqrt(in), 1/sqrt(in)).
    # Weights stored input-major [D_in, D_out] (= PyTorch W^T).
    bound = 1.0 / math.sqrt(hidden)
    w_lin = jax.random.uniform(k1, (hidden, hidden), jnp.float32, -bound, bound)
    b_lin = jax.random.uniform(k2, (hidden,), jnp.float32, -bound, bound)
    w_gate = jax.random.uniform(k3, (hidden, hidden), jnp.float32, -bound, bound)
    b_gate = jax.random.uniform(k4, (hidden,), jnp.float32, -bound, bound)

    # Fuse / pad the parameters ONCE (hoisted out of the per-call path).
    w_fused, b_fused, d = prepare_highway_params(w_lin, b_lin, w_gate, b_gate)

    out = highway(x, w_fused, b_fused, d)
    jax.block_until_ready(out)

    expect = highway_ref(x, w_lin, b_lin, w_gate, b_gate)
    assert jnp.allclose(out, expect, atol=1e-4, rtol=1e-4), \
        "mismatch vs reference (fused resident-weight path)"

    # Also validate the K-tiled streaming-weight path (forced here; normally it
    # is only selected when the fused weight exceeds the VMEM budget).
    d2, n2 = 256, 16
    kk = jax.random.split(jax.random.PRNGKey(1), 5)
    x2 = jax.random.normal(kk[0], (n2, d2), dtype=jnp.float32)
    b2 = 1.0 / math.sqrt(d2)
    wl2 = jax.random.uniform(kk[1], (d2, d2), jnp.float32, -b2, b2)
    bl2 = jax.random.uniform(kk[2], (d2,), jnp.float32, -b2, b2)
    wg2 = jax.random.uniform(kk[3], (d2, d2), jnp.float32, -b2, b2)
    bg2 = jax.random.uniform(kk[4], (d2,), jnp.float32, -b2, b2)
    wf2, bf2, dd2 = prepare_highway_params(wl2, bl2, wg2, bg2)

    out2 = highway(x2, wf2, bf2, dd2, _force_num_k_tiles=2)
    jax.block_until_ready(out2)
    exp2 = highway_ref(x2, wl2, bl2, wg2, bg2)
    assert jnp.allclose(out2, exp2, atol=1e-4, rtol=1e-4), \
        "mismatch vs reference (K-tiled streaming path)"

    print("KERNEL_OK")
</pallas_src>

<mosaic_0001>
module attributes {stable_mosaic.version = 11 : i64} {
  func.func @_highway_kernel_fused(%arg0: i32, %arg1: memref<8x128xf32, #tpu.memory_space<vmem>>, %arg2: memref<128x256xf32, #tpu.memory_space<vmem>>, %arg3: memref<1x256xf32, #tpu.memory_space<vmem>>, %arg4: memref<8x128xf32, #tpu.memory_space<vmem>>) attributes {dimension_semantics = [#tpu.dimension_semantics<parallel>], iteration_bounds = array<i64: 2>, scalar_prefetch = 0 : i64, scratch_operands = 0 : i64, tpu.core_type = #tpu.core_type<tc>, window_params = [{transform_indices = @transform_0, window_bounds = array<i64: 8, 128>}, {pipeline_mode = #tpu.pipeline_mode<synchronous>, transform_indices = @transform_1, window_bounds = array<i64: 128, 256>}, {pipeline_mode = #tpu.pipeline_mode<synchronous>, transform_indices = @transform_2, window_bounds = array<i64: 1, 256>}, {transform_indices = @transform_3, window_bounds = array<i64: 8, 128>}]} {
    %c0 = arith.constant 0 : index
    %c0_0 = arith.constant 0 : index
    %0 = vector.load %arg1[%c0, %c0_0] : memref<8x128xf32, #tpu.memory_space<vmem>>, vector<8x128xf32>
    %c0_1 = arith.constant 0 : index
    %c0_2 = arith.constant 0 : index
    %1 = vector.load %arg2[%c0_1, %c0_2] : memref<128x256xf32, #tpu.memory_space<vmem>>, vector<128x256xf32>
    %cst = arith.constant dense<0.000000e+00> : vector<8x256xf32>
    %2 = tpu.matmul %0, %1, %cst {dimension_numbers = #tpu.dot_dimension_numbers<[1], [0], [0], [1], [0, 0, 1, 1], [], []>} : vector<8x128xf32>, vector<128x256xf32>, vector<8x256xf32> -> vector<8x256xf32>
    %c0_3 = arith.constant 0 : index
    %c0_4 = arith.constant 0 : index
    %3 = vector.load %arg3[%c0_3, %c0_4] : memref<1x256xf32, #tpu.memory_space<vmem>>, vector<1x256xf32>
    %4 = vector.broadcast %3 : vector<1x256xf32> to vector<8x256xf32>
    %5 = arith.addf %2, %4 : vector<8x256xf32>
    %6 = vector.extract_strided_slice %5 {offsets = [0, 0], sizes = [8, 128], strides = [1, 1]} : vector<8x256xf32> to vector<8x128xf32>
    %cst_5 = arith.constant 0.000000e+00 : f32
    %7 = vector.broadcast %cst_5 : f32 to vector<8x128xf32>
    %8 = arith.maximumf %6, %7 : vector<8x128xf32>
    %9 = vector.extract_strided_slice %5 {offsets = [0, 128], sizes = [8, 128], strides = [1, 1]} : vector<8x256xf32> to vector<8x128xf32>
    %cst_6 = arith.constant 5.000000e-01 : f32
    %10 = vector.broadcast %cst_6 : f32 to vector<8x128xf32>
    %11 = arith.mulf %10, %9 : vector<8x128xf32>
    %12 = math.tanh %11 : vector<8x128xf32>
    %cst_7 = arith.constant 1.000000e+00 : f32
    %13 = vector.broadcast %cst_7 : f32 to vector<8x128xf32>
    %14 = arith.addf %12, %13 : vector<8x128xf32>
    %cst_8 = arith.constant 5.000000e-01 : f32
    %15 = vector.broadcast %cst_8 : f32 to vector<8x128xf32>
    %16 = arith.mulf %15, %14 : vector<8x128xf32>
    %17 = arith.subf %8, %0 : vector<8x128xf32>
    %18 = arith.mulf %16, %17 : vector<8x128xf32>
    %19 = arith.addf %0, %18 : vector<8x128xf32>
    %c0_9 = arith.constant 0 : index
    %c0_10 = arith.constant 0 : index
    %20 = vector.load %arg4[%c0_9, %c0_10] : memref<8x128xf32, #tpu.memory_space<vmem>>, vector<8x128xf32>
    tpu.vector_store %arg4[%c0_9, %c0_10], %19 {strides = array<i32>} : memref<8x128xf32, #tpu.memory_space<vmem>>, vector<8x128xf32>,
    return
  }
  func.func @transform_0(%arg0: i32) -> (i32, i32) {
    %c0_i32 = arith.constant 0 : i32
    %c0_i32_0 = arith.constant 0 : i32
    return %arg0, %c0_i32 : i32, i32
  }
  func.func @transform_1(%arg0: i32) -> (i32, i32) {
    %c0_i32 = arith.constant 0 : i32
    %c0_i32_0 = arith.constant 0 : i32
    %c0_i32_1 = arith.constant 0 : i32
    return %c0_i32, %c0_i32_0 : i32, i32
  }
  func.func @transform_2(%arg0: i32) -> (i32, i32) {
    %c0_i32 = arith.constant 0 : i32
    %c0_i32_0 = arith.constant 0 : i32
    %c0_i32_1 = arith.constant 0 : i32
    return %c0_i32, %c0_i32_0 : i32, i32
  }
  func.func @transform_3(%arg0: i32) -> (i32, i32) {
    %c0_i32 = arith.constant 0 : i32
    %c0_i32_0 = arith.constant 0 : i32
    return %arg0, %c0_i32 : i32, i32
  }
}

</mosaic_0001>

<bundles_post_ra>
// kernel: tpu_custom_call.1
= control target key start
LH: loop header
LB: loop body
LE: loop exit
PB: predicated region body
PF: predicated region fallthrough
CT: control target
= control target key end

     0   :  { %8 = vsyncpa [#allocation3], 0  ;;  %s837_s0 = inlined_call_operand.hbm [shape: f32[16,128], index: 0, kind: input, shape index: {}]   ;;  %s838_s1 = inlined_call_operand.hbm [shape: f32[128,256], index: 1, kind: input, shape index: {}]   ;;  %s839_s2 = inlined_call_operand.hbm [shape: f32[1,256], index: 2, kind: input, shape index: {}]   ;;  %s840_s3 = inlined_call_operand.hbm [shape: f32[16,128], index: 3, kind: output, shape index: {}]  }
   0x1   :  { %10 = vsyncpa [#allocation3 + $0x1], 0 }
   0x2   :  { %11 = vsyncpa [#allocation6], 0 }
   0x3   :  { %12 = vsyncpa [#allocation4], 0 }
   0x4   :  { %14 = vsyncpa [#allocation4 + $0x1], 0  ;;  %s685_s12 = smov 0   ;;  %s687_s13 = smov 0  }
   0x5   :  { %s689_s14 = smov 0   ;;  %s691_s15 = smov 0  }
   0x6 LB: > { %s130_s18 = sshll.u32 %s838_s1, 4  ;;  %s709_s19 = sadd.s32 4294967295, %s659_s15   ;;  %s659_s15 = sphi %s691_s15, %s851_s15   ;;  %s655_s14 = sphi %s689_s14, %s850_s14   ;;  %s651_s13 = sphi %s687_s13, %s849_s13   ;;  %s647_s12 = sphi %s685_s12, %s848_s12   ;;  %s131_s18 = int_to_ptr.hbm [resolvable:$true] %s130_s18 }
   0x7   : > { %p413_p0 = scmp.ge.s32.totalorder %s659_s15, 1  ;;  %p41_p1 = scmp.eq.s32.totalorder %s709_s19, 0 }
   0x8   : > { %p119_p2 = scmp.lt.s32.totalorder %s659_s15, 3  ;;  %s661_s21 = smov [#allocation5]  }
   0x9   : > { %s132_s22 = sshll.u32 %s661_s21, 4  ;;  %s145_s25 = sshll.u32 %s839_s2, 4  ;;  %s133_s22 = int_to_ptr.vmem [resolvable:$true] %s132_s22  ;;  %s146_s25 = int_to_ptr.hbm [resolvable:$true] %s145_s25 }
   0xa   : > { %p714_p3 = pnand %p413_p0, %p119_p2  ;;  %s662_s26 = smov [#allocation7]  }
   0xb   : > { %s147_s27 = sshll.u32 %s662_s26, 4  ;;  %s663_s28 = smov 256   ;;  %s148_s27 = int_to_ptr.vmem [resolvable:$true] %s147_s27 }
   0xc   : > { %p440_p4 = pneg %p714_p3  ;;  %s664_s29 = smov 16  }
   0xd   : > { %s412_s30 = sadd.s32 4294967294, %s659_s15   ;;  %s728_s4 = sadd.s32 1, %s659_s15  }
   0xe   : > { %p441_p6 = pnand %p440_p4, %p41_p1  ;;  %s24_s5 = ssub.s32 %s659_s15, %s728_s4 }
   0xf   : > { %s27_s6 = sadd.s32 1, %s655_s14  ;;  %p25_p7 = scmp.eq.s32.totalorder %s24_s5, 0 }
  0x10   : > { %443 = dma.hbm_to_vmem [thread:$0]  (!%p441_p6), %s131_s18, 4096, %s133_s22, [#allocation6], %s663_s28, %s663_s28, %s664_s29  }
  0x11   : > { %446 = dma.hbm_to_vmem [thread:$0]  (!%p441_p6), %s146_s25, 32, %s148_s27, [#allocation6]  }
  0x12   : > { %p34_p8 = scmp.ne.s32.totalorder %s655_s14, %s651_s13  ;;  %p35_p9 = scmp.eq.s32.totalorder %s659_s15, 0 }
  0x13   : > { %p40_p10 = scmp.ne.s32.totalorder %s651_s13, %s647_s12  ;;  %p106_p13 = scmp.eq.s32.totalorder %s709_s19, 1 }
  0x14   : > { %s739_s7 = scalar_select %p25_p7, %s655_s14, %s27_s6  }
  0x15   : > { %p741_p11 = por %p35_p9, %p34_p8  ;;  %p747_p12 = por %p41_p1, %p40_p10 }
  0x16   : > { %p112_p0 = scmp.eq.s32.totalorder %s412_s30, 1  ;;  %p457_p2 = scmp.lt.s32.totalorder %s659_s15, 2 }
  0x17   : > { %s158_s10 = sand.u32 1, %s655_s14   ;;  %p754_p4 = por %p106_p13, %p34_p8 }
  0x18   : > { %p758_p6 = por %p112_p0, %p40_p10  ;;  %s417_s17 = sshll.u32 %s158_s10, 3 }
  0x19   : > { %s418_s18 = sshll.u32 %s659_s15, 3  ;;  %s162_s24 = scalar_lea.vmem [#allocation2], %s417_s17 }
  0x1a   : > { %s166_s23 = scalar_lea.hbm %s837_s0, %s418_s18  ;;  %s170_s25 = sshll.u32 %s162_s24, 4  ;;  %s171_s25 = int_to_ptr.vmem [resolvable:$true] %s170_s25 }
  0x1b   : > { %s168_s26 = sshll.u32 %s166_s23, 4  ;;  %p768_p7 = pnand %p457_p2, %p741_p11  ;;  %s169_s26 = int_to_ptr.hbm [resolvable:$true] %s168_s26 }
  0x1c   : > { %s159_s28 = scalar_lea.sflag [#allocation3], %s158_s10  ;;  %s559_s29 = sshra.s32 %s169_s26, 4  ;;  %s560_s29 = int_to_ptr.hbm [resolvable:$true] %s559_s29 }
  0x1d   : > { %s561_s30 = scalar_lea.hbm %s560_s29, 8  ;;  %p563_p9 = pneg %p768_p7 }
  0x1e   : > { %p562_p8 = scmp.ne.s32.totalorder %s560_s29, %s561_s30  ;;  %s566_s17 = scalar_lea.hbm %s837_s0, 16 }
  0x1f   : > { %p567_p11 = scmp.lt.s32.totalorder %s560_s29, %s837_s0  ;;  %p568_p0 = scmp.lt.s32.totalorder %s566_s17, %s561_s30 }
  0x20   : > { %p564_p10 = pnand %p563_p9, %p562_p8 }
  0x21   : > { %p569_p2 = por %p568_p0, %p567_p11 }
  0x22   : > { %p565_p13 = pneg %p564_p10 }
  0x24   : > { %p570_p5 = pnand %p569_p2, %p565_p13 }
  0x26   : > { %573 = shalt.err (!%p570_p5)
}
  0x27   : > { %450 = dma.hbm_to_vmem [thread:$0]  (!%p768_p7), %s169_s26, 128, %s171_s25, %s159_s28  }
  0x28   : > { %179 = sbr.rel (%p714_p3) target bundleno = 228 (0xe4), region = 32  ;;  %s785_s10 = sand.u32 (!%p714_p3), 1, %s651_s13  }
  0x29   : > { %s420_s21 = sshll.u32 (!%p714_p3), %s785_s10, 3  ;;  %s182_s22 = scalar_lea.sflag (!%p714_p3), [#allocation3], %s785_s10 }
  0x2a   : > { %s791_s23 = scalar_lea.vmem (!%p714_p3), [#allocation2], %s420_s21 }
  0x2d   : > { %634 = dma.done.wait (%p747_p12), %s182_s22, 128  }
  0x2e   : > { %636 = vsyncadd (%p747_p12), %s182_s22, 4294967168 }
  0x2f   : > { %638 = dma.done.wait (%p41_p1), [#allocation6], 4128  }
  0x30   : > { %640 = vsyncadd (%p41_p1), [#allocation6], 4294963168  ;;  %v251_v0 = vld [vmem:[#allocation5 + $0xf8] sm:$0xff]  ;;  %v249_v1 = vld [vmem:[#allocation5 + $0xe8] sm:$0xff]  ;;  %s425_s20 = sshll.u32 %s709_s19, 3  ;;  %s218_s26 = scalar_lea.vmem [#allocation8], %s420_s21 }
  0x31   : > { %278 = vmatpush.msra.mxu1 %v251_v0  ;;  %v250_v2 = vld [vmem:[#allocation5 + $0xf0] sm:$0xff]  ;;  %v247_v3 = vld [vmem:[#allocation5 + $0xd8] sm:$0xff]  ;;  %v248_v4 = vld [vmem:[#allocation5 + $0xe0] sm:$0xff]  ;;  %s318_s25 = scalar_lea.hbm %s840_s3, %s425_s20  ;;  %s320_s27 = sshll.u32 %s218_s26, 4  ;;  %s321_s27 = int_to_ptr.vmem [resolvable:$true] %s320_s27 }
  0x32   : > { %258 = vmatpush.msra.mxu0 %v250_v2  ;;  %v246_v5 = vld [vmem:[#allocation5 + $0xd0] sm:$0xff]  ;;  %v245_v6 = vld [vmem:[#allocation5 + $0xc8] sm:$0xff]  ;;  %v244_v7 = vld [vmem:[#allocation5 + $0xc0] sm:$0xff]  ;;  %s322_s28 = sshll.u32 %s318_s25, 4  ;;  %s308_s29 = scalar_lea.sflag [#allocation4], %s785_s10  ;;  %s323_s28 = int_to_ptr.hbm [resolvable:$true] %s322_s28 }
  0x33   : > { %279 = vmatpush.msra.mxu1 %v249_v1  ;;  %v243_v8 = vld [vmem:[#allocation5 + $0xb8] sm:$0xff]  ;;  %v242_v9 = vld [vmem:[#allocation5 + $0xb0] sm:$0xff]  ;;  %v241_v10 = vld [vmem:[#allocation5 + $0xa8] sm:$0xff]  ;;  %s603_s19 = sshra.s32 %s323_s28, 4  ;;  %s609_s17 = scalar_lea.hbm %s840_s3, 16  ;;  %s604_s19 = int_to_ptr.hbm [resolvable:$true] %s603_s19 }
  0x34   : > { %259 = vmatpush.msra.mxu0 %v248_v4  ;;  %v240_v11 = vld [vmem:[#allocation5 + $0xa0] sm:$0xff]  ;;  %v239_v12 = vld [vmem:[#allocation5 + $0x98] sm:$0xff]  ;;  %v238_v13 = vld [vmem:[#allocation5 + $0x90] sm:$0xff]  ;;  %s605_s30 = scalar_lea.hbm %s604_s19, 8  ;;  %p610_p12 = scmp.lt.s32.totalorder %s604_s19, %s840_s3 }
  0x35   : > { %280 = vmatpush.msra.mxu1 %v247_v3  ;;  %v237_v14 = vld [vmem:[#allocation5 + $0x88] sm:$0xff]  ;;  %v236_v15 = vld [vmem:[#allocation5 + $0x80] sm:$0xff]  ;;  %v235_v16 = vld [vmem:[#allocation5 + $0x78] sm:$0xff]  ;;  %p606_p1 = scmp.ne.s32.totalorder %s604_s19, %s605_s30  ;;  %p611_p7 = scmp.lt.s32.totalorder %s609_s17, %s605_s30 }
  0x36   : > { %260 = vmatpush.msra.mxu0 %v246_v5  ;;  %v234_v17 = vld [vmem:[#allocation5 + $0x70] sm:$0xff]  ;;  %v233_v18 = vld [vmem:[#allocation5 + $0x68] sm:$0xff]  ;;  %v232_v19 = vld [vmem:[#allocation5 + $0x60] sm:$0xff] }
  0x37   : > { %281 = vmatpush.msra.mxu1 %v245_v6  ;;  %v231_v20 = vld [vmem:[#allocation5 + $0x58] sm:$0xff]  ;;  %v230_v21 = vld [vmem:[#allocation5 + $0x50] sm:$0xff]  ;;  %v229_v22 = vld [vmem:[#allocation5 + $0x48] sm:$0xff]  ;;  %p607_p3 = pnand %p606_p1, %p754_p4  ;;  %p612_p8 = por %p611_p7, %p610_p12 }
  0x38   : > { %261 = vmatpush.msra.mxu0 %v244_v7  ;;  %v228_v23 = vld [vmem:[#allocation5 + $0x40] sm:$0xff]  ;;  %v227_v24 = vld [vmem:[#allocation5 + $0x38] sm:$0xff]  ;;  %v226_v25 = vld [vmem:[#allocation5 + $0x30] sm:$0xff] }
  0x39   : > { %282 = vmatpush.msra.mxu1 %v243_v8  ;;  %v225_v26 = vld [vmem:[#allocation5 + $0x28] sm:$0xff]  ;;  %v224_v27 = vld [vmem:[#allocation5 + $0x20] sm:$0xff]  ;;  %v223_v28 = vld [vmem:[#allocation5 + $0x18] sm:$0xff]  ;;  %p608_p5 = pneg %p607_p3 }
  0x3a   : > { %262 = vmatpush.msra.mxu0 %v242_v9  ;;  %v222_v29 = vld [vmem:[#allocation5 + $0x10] sm:$0xff]  ;;  %v221_v30 = vld [vmem:[#allocation5 + $0x8] sm:$0xff]  ;;  %v220_v32 = vld [vmem:[#allocation5] sm:$0xff] }
  0x3b   : > { %283 = vmatpush.msra.mxu1 %v241_v10  ;;  %v219_v31 = vld [vmem:[%s791_s23] sm:$0xff]  ;;  %v252_v33 = vld [vmem:[#allocation7] sm:$0x3]  ;;  %p613_p9 = pnand %p612_p8, %p608_p5 }
  0x3c   : > { %263 = vmatpush.msra.mxu0 %v240_v11  ;;  %v255_v34 = vperm.slane %v252_v33, 1  ;;  %v254_v36 = vperm.slane %v252_v33, 0 }
  0x3d   : > { %284 = vmatpush.msra.mxu1 %v239_v12 }
  0x3e   : > { %264 = vmatpush.msra.mxu0 %v238_v13 }
  0x3f   : > { %285 = vmatpush.msra.mxu1 %v237_v14 }
  0x40   : > { %265 = vmatpush.msra.mxu0 %v236_v15 }
  0x41   : > { %286 = vmatpush.msra.mxu1 %v235_v16 }
  0x42   : > { %266 = vmatpush.msra.mxu0 %v234_v17 }
  0x43   : > { %287 = vmatpush.msra.mxu1 %v233_v18 }
  0x44   : > { %267 = vmatpush.msra.mxu0 %v232_v19 }
  0x45   : > { %288 = vmatpush.msra.mxu1 %v231_v20 }
  0x46   : > { %268 = vmatpush.msra.mxu0 %v230_v21 }
  0x47   : > { %289 = vmatpush.msra.mxu1 %v229_v22 }
  0x48   : > { %269 = vmatpush.msra.mxu0 %v228_v23 }
  0x49   : > { %290 = vmatpush.msra.mxu1 %v227_v24 }
  0x4a   : > { %270 = vmatpush.msra.mxu0 %v226_v25 }
  0x4b   : > { %291 = vmatpush.msra.mxu1 %v225_v26 }
  0x4c   : > { %271 = vmatpush.msra.mxu0 %v224_v27 }
  0x4d   : > { %292 = vmatpush.msra.mxu1 %v223_v28 }
  0x4e   : > { %272 = vmatpush.msra.mxu0 %v222_v29 }
  0x4f   : > { %293 = vmatpush.msra.mxu1 %v221_v30 }
  0x50   : > { %294 = vmatmul.f32.vlgmr.msra.gmra.mxu1 %v219_v31  ;;  %273 = vmatpush.msra.mxu0 %v220_v32 }
  0x51   : > { %274 = vmatmul.f32.vlgmr.msra.gmra.mxu0 %v219_v31 }
  0xcd   : > { %v295_v35 = vpop.f32.mrf.mxu1 }
  0xce   : > { %v296_v37 = vadd.f32 %v295_v35, %v255_v34  ;;  %v275_v38 = vpop.f32.mrf.mxu0 }
  0xcf   : > { %v276_v40 = vadd.f32 %v275_v38, %v254_v36 }
  0xd0   : > { %v299_v39 = vmul.f32 0.5, %v296_v37 }
  0xd1   : > { %v298_v41 = vmax.f32 %v276_v40, 0.0 }
  0xd2   : > { %497 = vtanh.f32 %v299_v39 }
  0xd3   : > { %v303_v44 = vsub.f32 %v298_v41, %v219_v31 }
  0xd8   : > { %v498_v42 = vpop.eup %497 }
  0xd9   : > { %v301_v43 = vadd.f32 1.0, %v498_v42 }
  0xdb   : > { %v302_v45 = vmul.f32 0.5, %v301_v43 }
  0xdd   : > { %v304_v46 = vmul.f32 %v303_v44, %v302_v45 }
  0xdf   : > { %v305_v47 = vadd.f32 %v304_v46, %v219_v31 }
  0xe1   : > { %306 = vst [vmem:[%s218_s26] sm:$0xff] %v305_v47 }
  0xe2   : > { %616 = shalt.err (!%p613_p9)
}
  0xe3   : > { %438 = dma.vmem_to_hbm [thread:$0]  (%p754_p4), %s321_s27, 128, %s323_s28, %s308_s29  }
  0xe4 PF: > { %s334_s10 = sand.u32 1, %s647_s12   ;;  %p847_p10 = scmp.ge.s32.totalorder %s659_s15, 2 }
  0xe5   : > { %s335_s21 = scalar_lea.sflag [#allocation4], %s334_s10 }
  0xe6   : > { %p452_p13 = pnand %p847_p10, %p758_p6 }
  0xe8   : > { %p453_p11 = pneg %p452_p13 }
  0xea   : > { %642 = dma.done.wait (%p453_p11), %s335_s21, 128  }
  0xeb   : > { %644 = vsyncadd (%p453_p11), %s335_s21, 4294967168  ;;  %p17_p0 = scmp.ge.s32.totalorder %s728_s4, 4   ;;  %s848_s12 = smov %s651_s13 }
  0xec   : > { %s849_s13 = smov %s655_s14  ;;  %s850_s14 = smov %s739_s7 }
  0xed   : > { %s851_s15 = smov %s728_s4  ;;  %19 = sbr.rel (!%p17_p0) target bundleno = 6 (0x6), region = 85 }
  0xf2   :  { %341 = vsyncpa [#allocation3], 1 }
  0xf3   :  { %343 = vsyncpa [#allocation3 + $0x1], 1 }
  0xf4   :  { %344 = vsyncpa [#allocation6], 1 }
  0xf5   :  { %345 = vsyncpa [#allocation4], 1 }
  0xf6   :  { %347 = vsyncpa [#allocation4 + $0x1], 1 }

</bundles_post_ra>
